<compile_context>
chip_gen: v5e
topology: v5e:2x2
jax: 0.10.0
libtpu: 0.0.40
codegen_flags: <defaults>
</compile_context>

<pallas_src>
import functools

import jax
import jax.numpy as jnp
from jax.experimental import pallas as pl
from jax.experimental.pallas import tpu as pltpu


# ----------------------------------------------------------------------------
# helpers: VMEM budgeting and tile selection
# ----------------------------------------------------------------------------
def _rl(n):   # round up to a lane multiple (128)
    return -(-int(n) // 128) * 128


def _rs(n):   # round up to a sublane multiple (8)
    return -(-int(n) // 8) * 8


def _vmem_budget_bytes():
    """~85% of this generation's physical VMEM (Mosaic scratch headroom)."""
    try:
        cap = int(pltpu.get_tpu_info().vmem_capacity_bytes)
    except Exception:
        cap = 64 * 2 ** 20            # conservative fallback (v7x-sized)
    return int(cap * 0.85)


def _inproj_vmem_bytes(S, D, H, hd, ts, cdt_b, in_b):
    f32 = 4
    est = 0
    est += 2 * _rs(ts) * _rl(D) * in_b              # x blocks (double-buffered)
    est += 2 * _rs(D) * _rl(D) * cdt_b              # w_in blocks
    est += 2 * 8 * _rl(D) * f32                     # b_in blocks
    est += 2 * H * _rs(ts) * _rl(hd) * cdt_b        # xp_heads output blocks
    est += 2 * H * _rs(hd) * _rl(ts) * cdt_b        # xp_headsT output blocks
    est += _rs(ts) * _rl(D) * (f32 + cdt_b)         # xp temporary (+ cast)
    return est


def _attn_vmem_bytes(S, D, H, hd, tq, cdt_b, out_b):
    f32 = 4
    est = 0
    est += 2 * H * _rs(S) * _rl(hd) * cdt_b         # query/value blocks
    est += 2 * H * _rs(hd) * _rl(S) * cdt_b         # transposed key blocks
    est += 2 * H * _rs(hd) * _rl(hd) * cdt_b        # attn_w blocks
    est += 2 * _rs(D) * _rl(D) * cdt_b              # w_out blocks
    est += 2 * 8 * _rl(D) * f32                     # b_out blocks
    est += 2 * _rs(tq) * _rl(D) * out_b             # output blocks
    est += H * _rs(tq) * _rl(S) * (f32 + cdt_b)     # scores (f32) + exp probs
    est += 2 * H * _rs(tq) * _rl(hd) * (f32 + cdt_b)   # t, pv (+ cast copies)
    est += _rs(tq) * _rl(D) * (f32 + cdt_b)         # concatenated pv + out
    return est


def _pick_s_tile(S, D, H, hd, cdt_b, in_b, budget):
    """Row tile for the in-projection kernel: must divide S and be either a
    multiple of 128 (so the transposed-key output block is lane-legal) or S."""
    cands = sorted({S} | {t for t in range(128, min(S, 1024) + 1, 128)
                          if S % t == 0})
    best = cands[0]
    for t in cands:                                 # keep the largest that fits
        if _inproj_vmem_bytes(S, D, H, hd, t, cdt_b, in_b) <= budget:
            best = t
    return best


def _pick_q_tile(S, D, H, hd, cdt_b, out_b, budget):
    """Largest query tile (multiple of 8 dividing S, or S itself) whose
    attention-kernel footprint fits the VMEM budget, capped at 512 rows."""
    cands = {t for t in range(8, min(S, 512) + 1, 8) if S % t == 0}
    if S <= 512:
        cands.add(S)                                # full-dim block always legal
    if not cands:
        cands = {S}
    cands = sorted(cands)
    best = cands[0]
    for t in cands:                                 # keep the largest that fits
        if _attn_vmem_bytes(S, D, H, hd, t, cdt_b, out_b) <= budget:
            best = t
    # TODO(synk): if even the smallest tile exceeds the budget the resident
    #             (H, S, hd) kv block itself is too big; key tiling with an
    #             online softmax would be required for such sequence lengths.
    return best


# ----------------------------------------------------------------------------
# kernel 1: in-projection + head split (two activation layouts)
# ----------------------------------------------------------------------------
def _in_project_kernel(x_ref, w_in_ref, b_in_ref, xph_ref, xphT_ref, *,
                       num_heads, head_dim):
    H, hd = num_heads, head_dim
    cdt = xph_ref.dtype
    xp = jnp.dot(x_ref[...].astype(cdt), w_in_ref[...],
                 preferred_element_type=jnp.float32) + b_in_ref[...]
    # Head split + key transpose happen ONCE per (batch, row-tile); every query
    # tile of the attention kernel then reads MXU-ready layouts straight from
    # HBM with no in-loop lane slicing or transposes.
    for h in range(H):                               # static, small H
        xh = xp[:, h * hd:(h + 1) * hd]              # (ts, hd) fp32
        xph_ref[h] = xh.astype(cdt)                  # values / queries layout
        xphT_ref[h] = xh.T.astype(cdt)               # keys layout (lane dim = S)


# ----------------------------------------------------------------------------
# kernel 2: pseudo-attention + fused output projection
# ----------------------------------------------------------------------------
def _attn_kernel(kv_ref, kT_ref, aw_ref, w_out_ref, b_out_ref, o_ref, *,
                 q_tile, exp_dtype):
    tq = q_tile
    cdt = kv_ref.dtype
    qi = pl.program_id(1)

    q_start = pl.multiple_of(qi * tq, tq)
    q = kv_ref[:, pl.ds(q_start, tq), :]                       # (H, tq, hd)

    # pseudo-attention scores: (q_h @ W_h) @ k_h^T (1/head_dim folded into W_h
    # by the wrapper).  All contractions are plain NN batched matmuls (MXU).
    t = jnp.einsum('hqd,hde->hqe', q, aw_ref[...],
                   preferred_element_type=jnp.float32)         # (H, tq, hd)
    scores = jnp.einsum('hqe,hek->hqk', t.astype(cdt), kT_ref[...],
                        preferred_element_type=jnp.float32)    # (H, tq, S) f32

    # softmax with DELAYED normalization: exp in `exp_dtype` (bf16 on v6e/v7x),
    # row sums accumulated in f32, and the 1/sum applied to the small pv tensor
    # (hd elements per row) instead of the (H, tq, S) probabilities.
    m = jnp.max(scores, axis=-1, keepdims=True)                # f32
    p = jnp.exp((scores - m).astype(exp_dtype))                # (H, tq, S)
    l = jnp.sum(p, axis=-1, keepdims=True, dtype=jnp.float32)  # (H, tq, 1) f32
    # TODO(synk): attn_dropout treated as identity (inference / eval mode).

    pv = jnp.einsum('hqk,hkd->hqd', p.astype(cdt), kv_ref[...],
                    preferred_element_type=jnp.float32)        # (H, tq, hd) f32
    pv = pv * pl.reciprocal(l)            # exact reciprocal over (H, tq, 1)

    # Fuse the head concat into ONE (tq, D) @ (D, D) output projection with a
    # full K = D contraction (no per-head K=hd matmuls, no head-sum pass).
    H = pv.shape[0]
    pv_flat = jnp.concatenate([pv[h] for h in range(H)], axis=-1)   # (tq, D)
    out = jnp.dot(pv_flat.astype(cdt), w_out_ref[...],
                  preferred_element_type=jnp.float32) + b_out_ref[...]
    o_ref[...] = out.astype(o_ref.dtype)


# ----------------------------------------------------------------------------
# wrapper
# ----------------------------------------------------------------------------
def optimized_mhsa(x, w_in, b_in, attn_w, w_out, b_out, *,
                   compute_dtype=jnp.bfloat16, q_tile=None):
    """x: (B, S, D); w_in / w_out: (D, D) stored as (in, out); b_*: (1, D);
    attn_w: (H, hd, hd).  compute_dtype is the MXU-operand / exp dtype
    (use float32 on v5e, which has no bf16 VPU/EUP)."""
    B, S, D = x.shape
    H, hd, _ = attn_w.shape
    assert H * hd == D, "model_dim must equal num_heads * head_dim"

    cdt = jnp.dtype(compute_dtype)
    cdt_b = cdt.itemsize
    out_dtype = x.dtype
    budget = _vmem_budget_bytes()

    # Fold the 1/head_dim score scale into the (tiny) attention weight and cast
    # the matmul parameters to the compute dtype once, outside the kernels.
    attn_w_scaled = (attn_w.astype(jnp.float32) * (1.0 / float(hd))).astype(cdt)
    w_in_c = w_in.astype(cdt)
    w_out_c = w_out.astype(cdt)
    b_in_f = b_in.astype(jnp.float32)
    b_out_f = b_out.astype(jnp.float32)

    # ---------------- kernel 1: in-projection + head split -------------------
    s_tile = _pick_s_tile(S, D, H, hd, cdt_b, x.dtype.itemsize, budget)
    inproj_est = _inproj_vmem_bytes(S, D, H, hd, s_tile, cdt_b, x.dtype.itemsize)

    xp_heads, xp_headsT = pl.pallas_call(
        functools.partial(_in_project_kernel, num_heads=H, head_dim=hd),
        out_shape=(jax.ShapeDtypeStruct((B, H, S, hd), cdt),
                   jax.ShapeDtypeStruct((B, H, hd, S), cdt)),
        grid_spec=pltpu.PrefetchScalarGridSpec(
            num_scalar_prefetch=0,
            grid=(B, S // s_tile),
            in_specs=[
                pl.BlockSpec((pl.Squeezed(), s_tile, D), lambda b, s: (b, s, 0)),
                pl.BlockSpec((D, D), lambda b, s: (0, 0)),
                pl.BlockSpec((1, D), lambda b, s: (0, 0)),
            ],
            out_specs=[
                pl.BlockSpec((pl.Squeezed(), H, s_tile, hd),
                             lambda b, s: (b, 0, s, 0)),
                pl.BlockSpec((pl.Squeezed(), H, hd, s_tile),
                             lambda b, s: (b, 0, 0, s)),
            ],
        ),
        compiler_params=pltpu.CompilerParams(
            dimension_semantics=("parallel", "parallel"),
            vmem_limit_bytes=int(min(budget,
                                     max(32 * 2 ** 20, 1.25 * inproj_est))),
        ),
        cost_estimate=pl.CostEstimate(
            flops=int(2 * B * S * D * D),
            transcendentals=0,
            bytes_accessed=int(B * S * D * (x.dtype.itemsize + 2 * cdt_b)
                               + D * D * cdt_b + D * 4),
        ),
    )(x, w_in_c, b_in_f)

    # ---------------- kernel 2: attention + fused out-projection -------------
    if q_tile is None:
        q_tile = _pick_q_tile(S, D, H, hd, cdt_b, out_dtype.itemsize, budget)
    assert S % q_tile == 0 and (q_tile == S or q_tile % 8 == 0)
    attn_est = _attn_vmem_bytes(S, D, H, hd, q_tile, cdt_b, out_dtype.itemsize)

    return pl.pallas_call(
        functools.partial(_attn_kernel, q_tile=q_tile, exp_dtype=cdt),
        out_shape=jax.ShapeDtypeStruct((B, S, D), out_dtype),
        grid_spec=pltpu.PrefetchScalarGridSpec(
            num_scalar_prefetch=0,
            grid=(B, S // q_tile),
            in_specs=[
                # q/v layout and transposed-key layout: block index is constant
                # across the query axis, so the DMA is issued once per batch.
                pl.BlockSpec((pl.Squeezed(), H, S, hd), lambda b, q: (b, 0, 0, 0)),
                pl.BlockSpec((pl.Squeezed(), H, hd, S), lambda b, q: (b, 0, 0, 0)),
                pl.BlockSpec((H, hd, hd), lambda b, q: (0, 0, 0)),   # scaled W_h
                pl.BlockSpec((D, D), lambda b, q: (0, 0)),           # w_out
                pl.BlockSpec((1, D), lambda b, q: (0, 0)),           # b_out
            ],
            out_specs=pl.BlockSpec((pl.Squeezed(), q_tile, D),
                                   lambda b, q: (b, q, 0)),
        ),
        compiler_params=pltpu.CompilerParams(
            # No scratch carried between query tiles, so BOTH axes are parallel
            # (v7x megacore can split either; previously q had to be arbitrary
            # because of the qi==0 activation-caching step).
            dimension_semantics=("parallel", "parallel"),
            vmem_limit_bytes=int(min(budget,
                                     max(32 * 2 ** 20, 1.25 * attn_est))),
        ),
        cost_estimate=pl.CostEstimate(
            flops=int(2 * B * S * D * hd + 4 * B * S * S * D
                      + 2 * B * S * D * D),
            transcendentals=int(B * H * S * S),
            bytes_accessed=int(2 * B * S * D * cdt_b
                               + B * S * D * out_dtype.itemsize
                               + (H * hd * hd + D * D) * cdt_b + 2 * D * 4),
        ),
    )(xp_heads, xp_headsT, attn_w_scaled, w_out_c, b_out_f)


# ----------------------------------------------------------------------------
# pure-JAX reference (mirrors the PyTorch forward, dropout = identity)
# ----------------------------------------------------------------------------
def _reference(x, w_in, b_in, attn_w, w_out, b_out):
    B, S, D = x.shape
    H, hd, _ = attn_w.shape
    xp = x @ w_in + b_in                                      # (B, S, D)
    xh = xp.reshape(B, S, H, hd).transpose(0, 2, 1, 3)        # (B, H, S, hd)
    w = jnp.einsum("bhsd,hde->bhse", xh, attn_w)              # (B, H, S, hd)
    scores = jnp.einsum("bhse,bhte->bhst", w, xh) / hd        # (B, H, S, S)
    p = jax.nn.softmax(scores, axis=-1)
    out = jnp.einsum("bhst,bhtd->bhsd", p, xh)                # (B, H, S, hd)
    out = out.transpose(0, 2, 1, 3).reshape(B, S, D)
    return out @ w_out + b_out


if __name__ == "__main__":
    # Small deterministic config consistent with the module.
    B, S, D, H = 2, 8, 32, 4
    hd = D // H

    key = jax.random.PRNGKey(0)
    k_x, k_wi, k_bi, k_aw, k_wo, k_bo = jax.random.split(key, 6)

    x = jax.random.normal(k_x, (B, S, D), dtype=jnp.float32)

    # nn.Linear-style init (uniform in [-1/sqrt(D), 1/sqrt(D)]), stored (in, out)
    bound = 1.0 / (D ** 0.5)
    w_in = jax.random.uniform(k_wi, (D, D), jnp.float32, -bound, bound)
    b_in = jax.random.uniform(k_bi, (1, D), jnp.float32, -bound, bound)
    w_out = jax.random.uniform(k_wo, (D, D), jnp.float32, -bound, bound)
    b_out = jax.random.uniform(k_bo, (1, D), jnp.float32, -bound, bound)
    # attn_weight ~ Normal(0, 0.02), shape (H, hd, hd) (leading dim of 1 dropped)
    attn_w = 0.02 * jax.random.normal(k_aw, (H, hd, hd), dtype=jnp.float32)

    ref = _reference(x, w_in, b_in, attn_w, w_out, b_out)

    # fp32 compute path (tight check vs. reference; also the v5e-recommended path)
    out_f32 = jax.block_until_ready(
        optimized_mhsa(x, w_in, b_in, attn_w, w_out, b_out,
                       compute_dtype=jnp.float32))
    assert out_f32.shape == (B, S, D)
    assert jnp.allclose(out_f32, ref, atol=1e-3, rtol=1e-3), "fp32 mismatch"

    # default bf16 path (bf16 MXU operands + bf16 exp, fp32 accumulation/stats)
    out_bf16 = jax.block_until_ready(
        optimized_mhsa(x, w_in, b_in, attn_w, w_out, b_out))
    assert out_bf16.shape == (B, S, D)
    assert jnp.allclose(out_bf16, ref, atol=2e-2, rtol=2e-2), "bf16 mismatch"

    print("KERNEL_OK")
</pallas_src>

<mosaic_0001>
module attributes {stable_mosaic.version = 11 : i64} {
  func.func @_in_project_kernel(%arg0: i32, %arg1: i32, %arg2: memref<1x8x32xf32, #tpu.memory_space<vmem>>, %arg3: memref<32x32xf32, #tpu.memory_space<vmem>>, %arg4: memref<1x32xf32, #tpu.memory_space<vmem>>, %arg5: memref<1x4x8x8xf32, #tpu.memory_space<vmem>>, %arg6: memref<1x4x8x8xf32, #tpu.memory_space<vmem>>) attributes {dimension_semantics = [#tpu.dimension_semantics<parallel>, #tpu.dimension_semantics<parallel>], iteration_bounds = array<i64: 2, 1>, scalar_prefetch = 0 : i64, scratch_operands = 0 : i64, tpu.core_type = #tpu.core_type<tc>, window_params = [{transform_indices = @transform_0, window_bounds = array<i64: 1, 8, 32>}, {pipeline_mode = #tpu.pipeline_mode<synchronous>, transform_indices = @transform_1, window_bounds = array<i64: 32, 32>}, {pipeline_mode = #tpu.pipeline_mode<synchronous>, transform_indices = @transform_2, window_bounds = array<i64: 1, 32>}, {transform_indices = @transform_3, window_bounds = array<i64: 1, 4, 8, 8>}, {transform_indices = @transform_4, window_bounds = array<i64: 1, 4, 8, 8>}]} {
    %c0 = arith.constant 0 : index
    %c0_0 = arith.constant 0 : index
    %c0_1 = arith.constant 0 : index
    %0 = vector.load %arg2[%c0, %c0_0, %c0_1] : memref<1x8x32xf32, #tpu.memory_space<vmem>>, vector<1x8x32xf32>
    %1 = vector.shape_cast %0 : vector<1x8x32xf32> to vector<8x32xf32>
    %c0_2 = arith.constant 0 : index
    %c0_3 = arith.constant 0 : index
    %2 = vector.load %arg3[%c0_2, %c0_3] : memref<32x32xf32, #tpu.memory_space<vmem>>, vector<32x32xf32>
    %cst = arith.constant dense<0.000000e+00> : vector<8x32xf32>
    %3 = tpu.matmul %1, %2, %cst {dimension_numbers = #tpu.dot_dimension_numbers<[1], [0], [0], [1], [0, 0, 1, 1], [], []>} : vector<8x32xf32>, vector<32x32xf32>, vector<8x32xf32> -> vector<8x32xf32>
    %c0_4 = arith.constant 0 : index
    %c0_5 = arith.constant 0 : index
    %4 = vector.load %arg4[%c0_4, %c0_5] : memref<1x32xf32, #tpu.memory_space<vmem>>, vector<1x32xf32>
    %5 = vector.broadcast %4 : vector<1x32xf32> to vector<8x32xf32>
    %6 = arith.addf %3, %5 : vector<8x32xf32>
    %7 = vector.extract_strided_slice %6 {offsets = [0, 0], sizes = [8, 8], strides = [1, 1]} : vector<8x32xf32> to vector<8x8xf32>
    %c0_6 = arith.constant 0 : index
    %c0_7 = arith.constant 0 : index
    %c0_8 = arith.constant 0 : index
    %c0_9 = arith.constant 0 : index
    %8 = vector.load %arg5[%c0_6, %c0_7, %c0_8, %c0_9] : memref<1x4x8x8xf32, #tpu.memory_space<vmem>>, vector<1x1x8x8xf32>
    %9 = vector.shape_cast %8 : vector<1x1x8x8xf32> to vector<8x8xf32>
    %10 = vector.shape_cast %7 : vector<8x8xf32> to vector<1x1x8x8xf32>
    tpu.vector_store %arg5[%c0_6, %c0_7, %c0_8, %c0_9], %10 {strides = array<i32>} : memref<1x4x8x8xf32, #tpu.memory_space<vmem>>, vector<1x1x8x8xf32>,
    %11 = tpu.transpose %7, [1, 0] : vector<8x8xf32> -> vector<8x8xf32>
    %c0_10 = arith.constant 0 : index
    %c0_11 = arith.constant 0 : index
    %c0_12 = arith.constant 0 : index
    %c0_13 = arith.constant 0 : index
    %12 = vector.load %arg6[%c0_10, %c0_11, %c0_12, %c0_13] : memref<1x4x8x8xf32, #tpu.memory_space<vmem>>, vector<1x1x8x8xf32>
    %13 = vector.shape_cast %12 : vector<1x1x8x8xf32> to vector<8x8xf32>
    %14 = vector.shape_cast %11 : vector<8x8xf32> to vector<1x1x8x8xf32>
    tpu.vector_store %arg6[%c0_10, %c0_11, %c0_12, %c0_13], %14 {strides = array<i32>} : memref<1x4x8x8xf32, #tpu.memory_space<vmem>>, vector<1x1x8x8xf32>,
    %15 = vector.extract_strided_slice %6 {offsets = [0, 8], sizes = [8, 8], strides = [1, 1]} : vector<8x32xf32> to vector<8x8xf32>
    %c0_14 = arith.constant 0 : index
    %c1 = arith.constant 1 : index
    %c0_15 = arith.constant 0 : index
    %c0_16 = arith.constant 0 : index
    %16 = vector.load %arg5[%c0_14, %c1, %c0_15, %c0_16] : memref<1x4x8x8xf32, #tpu.memory_space<vmem>>, vector<1x1x8x8xf32>
    %17 = vector.shape_cast %16 : vector<1x1x8x8xf32> to vector<8x8xf32>
    %18 = vector.shape_cast %15 : vector<8x8xf32> to vector<1x1x8x8xf32>
    tpu.vector_store %arg5[%c0_14, %c1, %c0_15, %c0_16], %18 {strides = array<i32>} : memref<1x4x8x8xf32, #tpu.memory_space<vmem>>, vector<1x1x8x8xf32>,
    %19 = tpu.transpose %15, [1, 0] : vector<8x8xf32> -> vector<8x8xf32>
    %c0_17 = arith.constant 0 : index
    %c1_18 = arith.constant 1 : index
    %c0_19 = arith.constant 0 : index
    %c0_20 = arith.constant 0 : index
    %20 = vector.load %arg6[%c0_17, %c1_18, %c0_19, %c0_20] : memref<1x4x8x8xf32, #tpu.memory_space<vmem>>, vector<1x1x8x8xf32>
    %21 = vector.shape_cast %20 : vector<1x1x8x8xf32> to vector<8x8xf32>
    %22 = vector.shape_cast %19 : vector<8x8xf32> to vector<1x1x8x8xf32>
    tpu.vector_store %arg6[%c0_17, %c1_18, %c0_19, %c0_20], %22 {strides = array<i32>} : memref<1x4x8x8xf32, #tpu.memory_space<vmem>>, vector<1x1x8x8xf32>,
    %23 = vector.extract_strided_slice %6 {offsets = [0, 16], sizes = [8, 8], strides = [1, 1]} : vector<8x32xf32> to vector<8x8xf32>
    %c0_21 = arith.constant 0 : index
    %c2 = arith.constant 2 : index
    %c0_22 = arith.constant 0 : index
    %c0_23 = arith.constant 0 : index
    %24 = vector.load %arg5[%c0_21, %c2, %c0_22, %c0_23] : memref<1x4x8x8xf32, #tpu.memory_space<vmem>>, vector<1x1x8x8xf32>
    %25 = vector.shape_cast %24 : vector<1x1x8x8xf32> to vector<8x8xf32>
    %26 = vector.shape_cast %23 : vector<8x8xf32> to vector<1x1x8x8xf32>
    tpu.vector_store %arg5[%c0_21, %c2, %c0_22, %c0_23], %26 {strides = array<i32>} : memref<1x4x8x8xf32, #tpu.memory_space<vmem>>, vector<1x1x8x8xf32>,
    %27 = tpu.transpose %23, [1, 0] : vector<8x8xf32> -> vector<8x8xf32>
    %c0_24 = arith.constant 0 : index
    %c2_25 = arith.constant 2 : index
    %c0_26 = arith.constant 0 : index
    %c0_27 = arith.constant 0 : index
    %28 = vector.load %arg6[%c0_24, %c2_25, %c0_26, %c0_27] : memref<1x4x8x8xf32, #tpu.memory_space<vmem>>, vector<1x1x8x8xf32>
    %29 = vector.shape_cast %28 : vector<1x1x8x8xf32> to vector<8x8xf32>
    %30 = vector.shape_cast %27 : vector<8x8xf32> to vector<1x1x8x8xf32>
    tpu.vector_store %arg6[%c0_24, %c2_25, %c0_26, %c0_27], %30 {strides = array<i32>} : memref<1x4x8x8xf32, #tpu.memory_space<vmem>>, vector<1x1x8x8xf32>,
    %31 = vector.extract_strided_slice %6 {offsets = [0, 24], sizes = [8, 8], strides = [1, 1]} : vector<8x32xf32> to vector<8x8xf32>
    %c0_28 = arith.constant 0 : index
    %c3 = arith.constant 3 : index
    %c0_29 = arith.constant 0 : index
    %c0_30 = arith.constant 0 : index
    %32 = vector.load %arg5[%c0_28, %c3, %c0_29, %c0_30] : memref<1x4x8x8xf32, #tpu.memory_space<vmem>>, vector<1x1x8x8xf32>
    %33 = vector.shape_cast %32 : vector<1x1x8x8xf32> to vector<8x8xf32>
    %34 = vector.shape_cast %31 : vector<8x8xf32> to vector<1x1x8x8xf32>
    tpu.vector_store %arg5[%c0_28, %c3, %c0_29, %c0_30], %34 {strides = array<i32>} : memref<1x4x8x8xf32, #tpu.memory_space<vmem>>, vector<1x1x8x8xf32>,
    %35 = tpu.transpose %31, [1, 0] : vector<8x8xf32> -> vector<8x8xf32>
    %c0_31 = arith.constant 0 : index
    %c3_32 = arith.constant 3 : index
    %c0_33 = arith.constant 0 : index
    %c0_34 = arith.constant 0 : index
    %36 = vector.load %arg6[%c0_31, %c3_32, %c0_33, %c0_34] : memref<1x4x8x8xf32, #tpu.memory_space<vmem>>, vector<1x1x8x8xf32>
    %37 = vector.shape_cast %36 : vector<1x1x8x8xf32> to vector<8x8xf32>
    %38 = vector.shape_cast %35 : vector<8x8xf32> to vector<1x1x8x8xf32>
    tpu.vector_store %arg6[%c0_31, %c3_32, %c0_33, %c0_34], %38 {strides = array<i32>} : memref<1x4x8x8xf32, #tpu.memory_space<vmem>>, vector<1x1x8x8xf32>,
    return
  }
  func.func @transform_0(%arg0: i32, %arg1: i32) -> (i32, i32, i32) {
    %c0_i32 = arith.constant 0 : i32
    %c0_i32_0 = arith.constant 0 : i32
    return %arg0, %arg1, %c0_i32 : i32, i32, i32
  }
  func.func @transform_1(%arg0: i32, %arg1: i32) -> (i32, i32) {
    %c0_i32 = arith.constant 0 : i32
    %c0_i32_0 = arith.constant 0 : i32
    %c0_i32_1 = arith.constant 0 : i32
    return %c0_i32, %c0_i32_0 : i32, i32
  }
  func.func @transform_2(%arg0: i32, %arg1: i32) -> (i32, i32) {
    %c0_i32 = arith.constant 0 : i32
    %c0_i32_0 = arith.constant 0 : i32
    %c0_i32_1 = arith.constant 0 : i32
    return %c0_i32, %c0_i32_0 : i32, i32
  }
  func.func @transform_3(%arg0: i32, %arg1: i32) -> (i32, i32, i32, i32) {
    %c0_i32 = arith.constant 0 : i32
    %c0_i32_0 = arith.constant 0 : i32
    %c0_i32_1 = arith.constant 0 : i32
    return %arg0, %c0_i32, %arg1, %c0_i32_0 : i32, i32, i32, i32
  }
  func.func @transform_4(%arg0: i32, %arg1: i32) -> (i32, i32, i32, i32) {
    %c0_i32 = arith.constant 0 : i32
    %c0_i32_0 = arith.constant 0 : i32
    %c0_i32_1 = arith.constant 0 : i32
    return %arg0, %c0_i32, %c0_i32_0, %arg1 : i32, i32, i32, i32
  }
}

</mosaic_0001>

<bundles_post_ra>
// kernel: tpu_custom_call.1
= control target key start
LH: loop header
LB: loop body
LE: loop exit
PB: predicated region body
PF: predicated region fallthrough
CT: control target
= control target key end

     0   :  { %10 = vsyncpa [#allocation3], 0  ;;  %s1122_s0 = inlined_call_operand.hbm [shape: f32[2,8,32], index: 0, kind: input, shape index: {}]   ;;  %s1123_s1 = inlined_call_operand.hbm [shape: f32[32,32], index: 1, kind: input, shape index: {}]   ;;  %s1124_s2 = inlined_call_operand.vmem [shape: f32[1,32], index: 2, kind: input, shape index: {}]   ;;  %s1125_s3 = inlined_call_operand.hbm [shape: f32[2,4,8,8], index: 3, kind: output, shape index: {0}]   ;;  %s1126_s4 = inlined_call_operand.hbm [shape: f32[2,4,8,8], index: 4, kind: output, shape index: {1}]  }
   0x1   :  { %12 = vsyncpa [#allocation3 + $0x1], 0 }
   0x2   :  { %13 = vsyncpa [#allocation6], 0 }
   0x3   :  { %14 = vsyncpa [#allocation4], 0 }
   0x4   :  { %16 = vsyncpa [#allocation4 + $0x1], 0 }
   0x5   :  { %17 = vsyncpa [#allocation9], 0 }
   0x6   :  { %19 = vsyncpa [#allocation9 + $0x1], 0  ;;  %s946_s15 = smov 0   ;;  %s948_s16 = smov 0  }
   0x7   :  { %s950_s17 = smov 0   ;;  %s952_s18 = smov 0  }
   0x8   :  { %s954_s19 = smov 0   ;;  %s956_s20 = smov 0  }
   0x9 LB: > { %s617_s21 = sadd.s32 4294967295, %s911_s20   ;;  %p619_p0 = scmp.ge.s32.totalorder %s911_s20, 1  ;;  %s911_s20 = sphi %s956_s20, %s25_s20   ;;  %s907_s19 = sphi %s954_s19, %s1137_s19   ;;  %s903_s18 = sphi %s952_s18, %s1136_s18   ;;  %s899_s17 = sphi %s950_s17, %s1135_s17   ;;  %s895_s16 = sphi %s948_s16, %s1134_s16   ;;  %s891_s15 = sphi %s946_s15, %s1133_s15  }
   0xa   : > { %p978_p1 = scmp.eq.s32.totalorder %s617_s21, 0  ;;  %p168_p2 = scmp.lt.s32.totalorder %s911_s20, 3 }
   0xb   : > { %s179_s25 = sshll.u32 %s1123_s1, 4  ;;  %s913_s27 = smov [#allocation5]   ;;  %s180_s25 = int_to_ptr.hbm [resolvable:$true] %s179_s25 }
   0xc   : > { %p986_p3 = pnand %p619_p0, %p168_p2  ;;  %s181_s28 = sshll.u32 %s913_s27, 4  ;;  %s182_s28 = int_to_ptr.vmem [resolvable:$true] %s181_s28 }
   0xd   : > { %p621_p6 = scmp.ge.s32.totalorder %s911_s20, 2  ;;  %s914_s29 = smov 128  }
   0xe   : > { %p656_p4 = pneg %p986_p3  ;;  %s915_s30 = smov 8  }
   0xf   : > { %s618_s5 = sadd.s32 4294967294, %s911_s20   ;;  %s37_s6 = sadd.s32 1, %s907_s19 }
  0x10   : > { %p657_p5 = pnand %p656_p4, %p978_p1  ;;  %s46_s7 = sadd.s32 1, %s899_s17 }
  0x11   : > { %p39_p7 = scmp.ge.s32.totalorder %s37_s6, 2  ;;  %p53_p8 = scmp.ne.s32.totalorder %s899_s17, %s895_s16 }
  0x12   : > { %659 = dma.hbm_to_vmem [thread:$0]  (!%p657_p5), %s180_s25, 512, %s182_s28, [#allocation6], %s914_s29, %s914_s29, %s915_s30  }
  0x13   : > { %p54_p9 = scmp.eq.s32.totalorder %s911_s20, 0  ;;  %p59_p10 = scmp.ne.s32.totalorder %s895_s16, %s891_s15 }
  0x14   : > { %s1139_s6 = smov (%p39_p7, %s37_s6), 0  ;;  %p127_p13 = scmp.eq.s32.totalorder %s617_s21, 1 }
  0x15   : > { %p1005_p11 = por %p54_p9, %p53_p8  ;;  %p1011_p12 = por %p978_p1, %p59_p10 }
  0x16   : > { %s41_s10 = ssub.s32 %s907_s19, %s1139_s6  ;;  %p133_p2 = scmp.eq.s32.totalorder %s618_s5, 1 }
  0x17   : > { %p44_p0 = scmp.eq.s32.totalorder %s41_s10, 0  ;;  %p1017_p4 = por %p127_p13, %p53_p8 }
  0x18   : > { %p672_p5 = scmp.lt.s32.totalorder %s911_s20, 2  ;;  %p1025_p7 = por %p133_p2, %p59_p10 }
  0x19   : > { %s1023_s12 = scalar_select %p44_p0, %s899_s17, %s46_s7  }
  0x1a   : > { %s198_s14 = sand.u32 1, %s899_s17   ;;  %s623_s24 = sshll.u32 %s907_s19, 3 }
  0x1b   : > { %s622_s23 = sshll.u32 %s198_s14, 3  ;;  %s207_s21 = scalar_lea.hbm %s1122_s0, %s623_s24 }
  0x1c   : > { %s202_s28 = scalar_lea.vmem [#allocation2], %s622_s23  ;;  %s209_s30 = sshll.u32 %s207_s21, 4  ;;  %s210_s30 = int_to_ptr.hbm [resolvable:$true] %s209_s30 }
  0x1d   : > { %s211_s29 = sshll.u32 %s202_s28, 4  ;;  %p661_p8 = pnand %p672_p5, %p1005_p11  ;;  %s212_s29 = int_to_ptr.vmem [resolvable:$true] %s211_s29 }
  0x1e   : > { %s199_s5 = scalar_lea.sflag [#allocation3], %s198_s14  ;;  %220 = sbr.rel (%p986_p3) target bundleno = 653 (0x28d), region = 32 }
  0x1f   : > { %663 = dma.hbm_to_vmem [thread:$0]  (!%p661_p8), %s210_s30, 128, %s212_s29, %s199_s5  }
  0x20   : > { %s1039_s7 = sand.u32 (!%p986_p3), 1, %s895_s16  }
  0x21   : > { %s625_s10 = sshll.u32 (!%p986_p3), %s1039_s7, 3  ;;  %s223_s24 = scalar_lea.sflag (!%p986_p3), [#allocation3], %s1039_s7 }
  0x22   : > { %s226_s23 = scalar_lea.vmem (!%p986_p3), [#allocation2], %s625_s10 }
  0x23   : > { %874 = dma.done.wait (%p1011_p12), %s223_s24, 128  }
  0x24   : > { %876 = vsyncadd (%p1011_p12), %s223_s24, 4294967168 }
  0x25   : > { %878 = dma.done.wait (%p978_p1), [#allocation6], 512  }
  0x26   : > { %880 = vsyncadd (%p978_p1), [#allocation6], 4294966784  ;;  %v266_v0 = vld [vmem:[#allocation5 + $0x18] sm:$0xff]  ;;  %v265_v1 = vld [vmem:[#allocation5 + $0x10] sm:$0xff]  ;;  %vm271_vm0 = vcmask 261120   ;;  %s627_s9 = sshll.u32 %s1039_s7, 5 }
  0x27   : > { %287 = vmatpush.msra.mxu0 %v266_v0  ;;  %v264_v2 = vld [vmem:[#allocation5 + $0x8] sm:$0xff]  ;;  %v263_v3 = vld [vmem:[#allocation5] sm:$0xff]  ;;  %v262_v4 = vld [vmem:[%s226_s23] sm:$0xff]  ;;  %vm295_vm1 = vcmask 64512   ;;  %s916_s22 = smov 112   ;;  %s254_s14 = scalar_lea.vmem [#allocation7], %s627_s9 }
  0x28   : > { %v732_v5 = vld [vmem:[%s1124_s2] ss:$0 sm:$0xff]  ;;  %s917_s25 = smov 120   ;;  %s1057_s27 = scalar_lea.vmem [#allocation8], %s627_s9 }
  0x29   : > { %288 = vmatpush.msra.mxu0 %v265_v1  ;;  %s918_s21 = smov 104   ;;  %s467_s28 = sshll.u32 %s254_s14, 4  ;;  %s468_s28 = int_to_ptr.vmem [resolvable:$true] %s467_s28 }
  0x2a   : > { %s644_s29 = sshll.u32 %s903_s18, 5  ;;  %s449_s23 = scalar_lea.sflag [#allocation4], %s1039_s7 }
  0x2b   : > { %289 = vmatpush.msra.mxu0 %v264_v2  ;;  %s466_s10 = scalar_lea.hbm %s1125_s3, %s644_s29 }
  0x2c   : > { %s469_s24 = sshll.u32 %s466_s10, 4  ;;  %s470_s24 = int_to_ptr.hbm [resolvable:$true] %s469_s24 }
  0x2d   : > { %290 = vmatpush.msra.mxu0 %v263_v3  ;;  %s807_s26 = sshra.s32 %s470_s24, 4  ;;  %s808_s26 = int_to_ptr.hbm [resolvable:$true] %s807_s26 }
  0x2e   : > { %629 = vmatmul.msk.f32.vlgmr.msra.gmra.mxu0 %vm271_vm0, %v262_v4  ;;  %s809_s8 = scalar_lea.hbm %s808_s26, 32  ;;  %p814_p10 = scmp.lt.s32.totalorder %s808_s26, %s1125_s3 }
  0x2f   : > { %p810_p1 = scmp.ne.s32.totalorder %s808_s26, %s809_s8 }
  0x31   : > { %p811_p3 = pnand %p810_p1, %p1017_p4 }
  0x33   : > { %p812_p9 = pneg %p811_p3 }
  0xab   : > { %v292_v6 = vpop.f32.mrf.mxu0 }
  0xac   : > { %v293_v7 = vadd.f32 %v732_v5, %v292_v6 }
  0xae   : > { %370 = vrot.lane.b32.xlu1 %v293_v7, %s916_s22  ;;  %297 = vxpose.xlu0.b32.start.end [1/1] (short) (narrow) %v293_v7, 8  ;;  %296 = vst.msk [vmem:[%s254_s14] sm:$0xff] %vm295_vm1, %v293_v7 }
 0x11c   : > { %331 = vrot.lane.b32.xlu0 %v293_v7, %s917_s25 }
 0x120   : > { %v371_v8 = vpop.permute.xlu1 %370 }
 0x121   : > { %632 = vst.msk [vmem:[%s254_s14 + $0x10] sm:$0xff] %vm295_vm1, %v371_v8  ;;  %375 = vxpose.xlu2.b32.start.end [1/1] (short) (narrow) %v371_v8, 8 }
 0x152   : > { %v313_v9 = vpop.trf.xlu0 }
 0x153   : > { %329 = vst.msk [vmem:[%s1057_s27] sm:$0xff] %vm295_vm1, %v313_v9 }
 0x18a   : > { %409 = vrot.lane.b32.xlu2 %v293_v7, %s918_s21 }
 0x18e   : > { %v332_v10 = vpop.permute.xlu0 %331 }
 0x18f   : > { %630 = vst.msk [vmem:[%s254_s14 + $0x8] sm:$0xff] %vm295_vm1, %v332_v10  ;;  %336 = vxpose.xlu1.b32.start.end [1/1] (short) (narrow) %v332_v10, 8 }
 0x1ba   : > { %v391_v11 = vpop.trf.xlu2 }
 0x1bb   : > { %633 = vst.msk [vmem:[%s1057_s27 + $0x10] sm:$0xff] %vm295_vm1, %v391_v11 }
 0x1e4   : > { %v410_v12 = vpop.permute.xlu2 %409 }
 0x1e5   : > { %634 = vst.msk [vmem:[%s254_s14 + $0x18] sm:$0xff] %vm295_vm1, %v410_v12  ;;  %414 = vxpose.xlu1.b32.start.end [1/1] (short) (narrow) %v410_v12, 8  ;;  %s813_s14 = scalar_lea.hbm %s1125_s3, 64 }
 0x1e6   : > { %p815_p11 = scmp.lt.s32.totalorder %s813_s14, %s809_s8 }
 0x1e8   : > { %p816_p12 = por %p815_p11, %p814_p10 }
 0x1ea   : > { %p817_p13 = pnand %p816_p12, %p812_p9 }
 0x1ec   : > { %820 = shalt.err (!%p817_p13)
}
 0x1ed   : > { %s919_s21 = smov 128   ;;  %s920_s30 = smov 8  }
 0x1ee   : > { %652 = dma.vmem_to_hbm [thread:$0]  (%p1017_p4), %s468_s28, 512, %s470_s24, %s449_s23, %s919_s21, %s919_s21, %s920_s30  }
 0x1ef   : > { %s484_s26 = scalar_lea.hbm %s1126_s4, %s644_s29  ;;  %s485_s8 = sshll.u32 %s1057_s27, 4  ;;  %s486_s8 = int_to_ptr.vmem [resolvable:$true] %s485_s8 }
 0x1f0   : > { %s487_s9 = sshll.u32 %s484_s26, 4  ;;  %s454_s22 = scalar_lea.sflag [#allocation9], %s1039_s7  ;;  %s488_s9 = int_to_ptr.hbm [resolvable:$true] %s487_s9 }
 0x1f1   : > { %s835_s14 = sshra.s32 %s488_s9, 4  ;;  %s841_s23 = scalar_lea.hbm %s1126_s4, 64  ;;  %s836_s14 = int_to_ptr.hbm [resolvable:$true] %s835_s14 }
 0x1f2   : > { %s837_s18 = scalar_lea.hbm %s836_s14, 32  ;;  %p842_p8 = scmp.lt.s32.totalorder %s836_s14, %s1126_s4 }
 0x1f3   : > { %p838_p0 = scmp.ne.s32.totalorder %s836_s14, %s837_s18  ;;  %p843_p1 = scmp.lt.s32.totalorder %s841_s23, %s837_s18 }
 0x1f5   : > { %p839_p2 = pnand %p838_p0, %p1017_p4  ;;  %p844_p3 = por %p843_p1, %p842_p8 }
 0x1f7   : > { %p840_p5 = pneg %p839_p2 }
 0x1f9   : > { %p845_p9 = pnand %p844_p3, %p840_p5 }
 0x233   : > { %v352_v13 = vpop.trf.xlu1 }
 0x234   : > { %631 = vst.msk [vmem:[%s1057_s27 + $0x8] sm:$0xff] %vm295_vm1, %v352_v13 }
 0x289   : > { %v430_v14 = vpop.trf.xlu1 }
 0x28a   : > { %635 = vst.msk [vmem:[%s1057_s27 + $0x18] sm:$0xff] %vm295_vm1, %v430_v14 }
 0x28b   : > { %848 = shalt.err (!%p845_p9)
}
 0x28c   : > { %653 = dma.vmem_to_hbm [thread:$0]  (%p1017_p4), %s486_s8, 512, %s488_s9, %s454_s22, %s919_s21, %s919_s21, %s920_s30  }
 0x28d PF: > { %s502_s7 = sand.u32 1, %s891_s15   ;;  %p665_p10 = pnand %p621_p6, %p1025_p7 }
 0x28e   : > { %s503_s27 = scalar_lea.sflag [#allocation4], %s502_s7 }
 0x28f   : > { %p666_p11 = pneg %p665_p10 }
 0x291   : > { %882 = dma.done.wait (%p666_p11), %s503_s27, 512  }
 0x292   : > { %884 = vsyncadd (%p666_p11), %s503_s27, 4294966784  ;;  %s513_s5 = scalar_lea.sflag [#allocation9], %s502_s7 }
 0x293   : > { %886 = dma.done.wait (%p666_p11), %s513_s5, 512  }
 0x294   : > { %888 = vsyncadd (%p666_p11), %s513_s5, 4294966784  ;;  %s25_s20 = sadd.s32 1, %s911_s20   ;;  %s1133_s15 = smov %s895_s16 }
 0x295   : > { %p22_p12 = scmp.ge.s32.totalorder %s25_s20, 4   ;;  %s1134_s16 = smov %s899_s17 }
 0x296   : > { %s1135_s17 = smov %s1023_s12  ;;  %s1136_s18 = smov %s907_s19 }
 0x297   : > { %s1137_s19 = smov %s1139_s6  ;;  %24 = sbr.rel (!%p22_p12) target bundleno = 9 (0x9), region = 104 }
 0x29c   :  { %519 = vsyncpa [#allocation3], 1 }
 0x29d   :  { %521 = vsyncpa [#allocation3 + $0x1], 1 }
 0x29e   :  { %522 = vsyncpa [#allocation6], 1 }
 0x29f   :  { %523 = vsyncpa [#allocation4], 1 }
 0x2a0   :  { %525 = vsyncpa [#allocation4 + $0x1], 1 }
 0x2a1   :  { %526 = vsyncpa [#allocation9], 1 }
 0x2a2   :  { %528 = vsyncpa [#allocation9 + $0x1], 1 }

</bundles_post_ra>
